<compile_context>
chip_gen: v7x
topology: tpu7x:2x2x1
jax: 0.10.0
libtpu: 0.0.40
codegen_flags: <defaults>
</compile_context>

<pallas_src>
import math

import jax
import jax.numpy as jnp
from jax.experimental import pallas as pl
from jax.experimental.pallas import tpu as pltpu

BN_EPS = 1e-3  # scvi FCLayers: nn.BatchNorm1d(n_out, momentum=0.01, eps=0.001)


# ----------------------------------------------------------------------------
# Generation-aware VMEM configuration
# ----------------------------------------------------------------------------
def _vmem_config():
    """Return (vmem_limit_bytes, per-tile working-set budget)."""
    cap = None
    try:
        info = pltpu.get_tpu_info()
        cap = int(getattr(info, "vmem_capacity_bytes", 0)) or None
    except Exception:
        cap = None
    if cap is None or cap <= 80 * 1024 * 1024:
        # v7x-class (64 MiB per TensorCore) or unknown: stay conservative.
        return 48 * 1024 * 1024, 20 * 1024 * 1024
    # v5e / v6e: 128 MiB physical VMEM -> big tiles get closest to HBM roofline.
    return 96 * 1024 * 1024, 64 * 1024 * 1024


# ----------------------------------------------------------------------------
# In-kernel building blocks
# ----------------------------------------------------------------------------
def _fc_block(x, w, b, gamma, beta):
    """One FCLayers layer: Linear -> BatchNorm1d (train mode) -> ReLU.

    Dropout rate is 0.0 -> identity.  BatchNorm uses full-batch statistics
    (biased variance) in f32; affine is fused into a single scale/shift.
    """
    h = jnp.dot(x, w, preferred_element_type=jnp.float32) + b
    mean = jnp.mean(h, axis=0, keepdims=True)
    var = jnp.mean((h - mean) ** 2, axis=0, keepdims=True)
    scale = gamma * jax.lax.rsqrt(var + BN_EPS)
    return jnp.maximum((h - mean) * scale + beta, 0.0)


def _sigmoid(x):
    # One EUP transcendental (tanh) instead of exp + divide.
    return 0.5 * (jnp.tanh(0.5 * x) + 1.0)


def _softplus(x):
    # Stable single-exp form: max(x,0) + log(1 + exp(-|x|)).
    return jnp.maximum(x, 0.0) + jnp.log(1.0 + jnp.exp(-jnp.abs(x)))


def _global_kernel(z_ref, w1_ref, b1_ref, g1_ref, be1_ref,
                   wt_ref, bt_ref, prob_t_ref):
    rho_first = _fc_block(z_ref[...], w1_ref[...], b1_ref[...],
                          g1_ref[...], be1_ref[...])
    # Head output width is 1: an MXU matmul would waste the whole column
    # dimension and emit lane-sparse stores, so use VPU mul + lane reduction.
    logits = jnp.sum(rho_first * wt_ref[...], axis=-1, keepdims=True) + bt_ref[...]
    prob_t_ref[...] = _sigmoid(logits)


def _first_fc_kernel(zin_ref, z_ref,
                     rw1_ref, rb1_ref, rg1_ref, rbe1_ref,
                     pw1_ref, pb1_ref, pg1_ref, pbe1_ref,
                     rho_first_ref, pi_first_ref):
    # Computed ONCE (no grid) so BatchNorm statistics use the full batch.
    rho_first_ref[...] = _fc_block(zin_ref[...], rw1_ref[...], rb1_ref[...],
                                   rg1_ref[...], rbe1_ref[...]
                                   ).astype(rho_first_ref.dtype)
    pi_first_ref[...] = _fc_block(z_ref[...], pw1_ref[...], pb1_ref[...],
                                  pg1_ref[...], pbe1_ref[...]
                                  ).astype(pi_first_ref.dtype)


def _heads_kernel(rho_first_ref, pi_first_ref,
                  wpi_ref, bpi_ref, wrt_ref, brt_ref,
                  pi_ref, rho_ref, tau_ref):
    # Grid axis = gene tiles ("parallel"; nothing is carried across tiles, so
    # it is megacore-safe).  Both (B,H) activations are resident bf16 inputs.
    tg = rho_ref.shape[-1]  # static TILE_G

    # Fused rho+tau head: one bf16 MXU matmul per tile over [H, 2*TILE_G];
    # per-tile column layout is [rho-cols | tau-cols] (built once at prep).
    fused = jnp.dot(rho_first_ref[...], wrt_ref[...],
                    preferred_element_type=jnp.float32) + brt_ref[...]
    sig = _sigmoid(fused)
    rho_ref[...] = sig[:, :tg].astype(rho_ref.dtype)
    tau_ref[...] = sig[:, tg:].astype(tau_ref.dtype)

    pi_logits = (jnp.dot(pi_first_ref[...], wpi_ref[...],
                         preferred_element_type=jnp.float32) + bpi_ref[...])
    pi_ref[...] = _softplus(pi_logits).astype(pi_ref.dtype)


# ----------------------------------------------------------------------------
# Tile-size selection (full VMEM accounting)
# ----------------------------------------------------------------------------
def _pick_tile_g(g_padded, batch, n_hidden, budget, out_bytes=4):
    """Largest lane-multiple gene tile dividing g_padded within the budget.

    Prefers configurations with an even n_tiles >= 4 so each of v7x's two
    TensorCores gets >= 2 pipelined steps.
    """
    def footprint(tg):
        resident = 2 * (2 * batch * n_hidden * 2)            # 2x bf16 (B,H), 2 bufs
        per_tile_in = n_hidden * 5 * tg * 2 + 5 * tg * 4     # bf16 weights + f32 bias
        per_tile_out = batch * 5 * tg * out_bytes            # pi(3tg)+rho(tg)+tau(tg)
        interm = batch * 5 * tg * (4 + 2)                    # f32 logits + casts
        return resident + 2 * (per_tile_in + per_tile_out) + interm

    cands = [c for c in range(128, min(g_padded, 2048) + 1, 128)
             if g_padded % c == 0]
    feasible = [c for c in cands if footprint(c) <= budget]
    if not feasible:
        return 128
    pref1 = [c for c in feasible
             if (g_padded // c) >= 4 and (g_padded // c) % 2 == 0]
    if pref1:
        return max(pref1)
    pref2 = [c for c in feasible if (g_padded // c) >= 2]
    if pref2:
        return max(pref2)
    return max(feasible)


# ----------------------------------------------------------------------------
# One-time parameter preparation (NOT on the per-forward path)
# ----------------------------------------------------------------------------
def prepare_global_params(params):
    H = params["rho_w1"].shape[1]
    limit, _ = _vmem_config()
    return {
        "rho_w1": params["rho_w1"], "rho_b1": params["rho_b1"],
        "rho_g1": params["rho_g1"], "rho_be1": params["rho_be1"],
        "t_w_row": params["t_w"].reshape(1, H),   # [H,1] -> lane-major row
        "t_b": params["t_b"],
        "vmem_limit": limit,
    }


def prepare_decouple_params(params, n_output, tile_g=None,
                            weight_dtype=jnp.bfloat16):
    """Fuse rho/tau heads, pad genes to a lane multiple, cast heads to bf16,
    and pick the gene tile.  Call once per parameter set."""
    H = params["rho_w1"].shape[1]
    G = n_output
    Gp = ((G + 127) // 128) * 128
    pad = Gp - G
    limit, budget = _vmem_config()

    B_hint = 8  # tile choice only needs an order-of-magnitude batch; outputs
    if tile_g is None:
        tile_g = _pick_tile_g(Gp, B_hint, H, budget)
    assert Gp % tile_g == 0, "tile_g must divide the padded gene count"
    n_tiles = Gp // tile_g

    def pad_cols(w, mult):
        return w if pad == 0 else jnp.pad(w, ((0, 0), (0, mult * pad)))

    # Fused rho+tau head; per gene tile the columns are [rho_tile | tau_tile]
    # so the kernel splits at a lane-aligned boundary.
    rho_w = pad_cols(params["pxrho_w"], 1).reshape(H, n_tiles, tile_g)
    tau_w = pad_cols(params["pxtau_w"], 1).reshape(H, n_tiles, tile_g)
    w_rt = jnp.concatenate([rho_w, tau_w], axis=2).reshape(H, 2 * Gp)
    rho_b = pad_cols(params["pxrho_b"], 1).reshape(1, n_tiles, tile_g)
    tau_b = pad_cols(params["pxtau_b"], 1).reshape(1, n_tiles, tile_g)
    b_rt = jnp.concatenate([rho_b, tau_b], axis=2).reshape(1, 2 * Gp)

    # pi head: torch Linear(H, 3G) reshaped to (B,G,3) -> columns stay grouped
    # per gene (3 contiguous), so gene padding is a plain right-pad by 3*pad.
    w_pi = pad_cols(params["pxpi_w"], 3)
    b_pi = pad_cols(params["pxpi_b"], 3)

    return {
        "H": H, "G": G, "Gp": Gp, "tile_g": tile_g, "n_tiles": n_tiles,
        "rho_w1": params["rho_w1"], "rho_b1": params["rho_b1"],
        "rho_g1": params["rho_g1"], "rho_be1": params["rho_be1"],
        "pi_w1": params["pi_w1"], "pi_b1": params["pi_b1"],
        "pi_g1": params["pi_g1"], "pi_be1": params["pi_be1"],
        "w_pi": w_pi.astype(weight_dtype), "b_pi": b_pi,
        "w_rt": w_rt.astype(weight_dtype), "b_rt": b_rt,
        "vmem_limit": limit,
    }


# ----------------------------------------------------------------------------
# Forward wrappers
# ----------------------------------------------------------------------------
def _mask_z(z, latent_dim):
    if latent_dim is None:
        return z
    mask = jnp.zeros((1, z.shape[1]), z.dtype).at[0, latent_dim].set(1.0)
    return z * mask


def decoder_velovi_global(z, prepped, latent_dim=None):
    B = z.shape[0]
    z_in = _mask_z(z, latent_dim)
    args = [z_in, prepped["rho_w1"], prepped["rho_b1"], prepped["rho_g1"],
            prepped["rho_be1"], prepped["t_w_row"], prepped["t_b"]]
    vmem_spec = pl.BlockSpec(memory_space=pltpu.MemorySpace.VMEM)
    return pl.pallas_call(
        _global_kernel,
        out_shape=jax.ShapeDtypeStruct((B, 1), jnp.float32),
        in_specs=[vmem_spec] * len(args),
        out_specs=vmem_spec,
        compiler_params=pltpu.CompilerParams(
            vmem_limit_bytes=prepped["vmem_limit"]),
    )(*args)


def decoder_velovi_decouple(z, prepped, latent_dim=None,
                            out_dtype=jnp.float32):
    B = z.shape[0]
    H, G, Gp = prepped["H"], prepped["G"], prepped["Gp"]
    tile_g, n_tiles = prepped["tile_g"], prepped["n_tiles"]
    vmem_limit = prepped["vmem_limit"]

    # ---- Stage 1: shared first FC layers, computed once (no grid) ----------
    z_in = _mask_z(z, latent_dim)     # rho branch uses masked z, pi uses raw z
    first_args = [z_in, z,
                  prepped["rho_w1"], prepped["rho_b1"],
                  prepped["rho_g1"], prepped["rho_be1"],
                  prepped["pi_w1"], prepped["pi_b1"],
                  prepped["pi_g1"], prepped["pi_be1"]]
    vmem_spec = pl.BlockSpec(memory_space=pltpu.MemorySpace.VMEM)
    rho_first, pi_first = pl.pallas_call(
        _first_fc_kernel,
        out_shape=(jax.ShapeDtypeStruct((B, H), jnp.bfloat16),
                   jax.ShapeDtypeStruct((B, H), jnp.bfloat16)),
        in_specs=[vmem_spec] * len(first_args),
        out_specs=(vmem_spec, vmem_spec),
        compiler_params=pltpu.CompilerParams(vmem_limit_bytes=vmem_limit),
    )(*first_args)

    # ---- Stage 2: gene-tiled heads (pipelined weight + output streaming) ----
    head_args = [rho_first, pi_first,
                 prepped["w_pi"], prepped["b_pi"],
                 prepped["w_rt"], prepped["b_rt"]]
    in_specs = [
        pl.BlockSpec((B, H), lambda j: (0, 0)),
        pl.BlockSpec((B, H), lambda j: (0, 0)),
        pl.BlockSpec((H, 3 * tile_g), lambda j: (0, j)),
        pl.BlockSpec((1, 3 * tile_g), lambda j: (0, j)),
        pl.BlockSpec((H, 2 * tile_g), lambda j: (0, j)),
        pl.BlockSpec((1, 2 * tile_g), lambda j: (0, j)),
    ]
    out_shapes = (jax.ShapeDtypeStruct((B, 3 * Gp), out_dtype),
                  jax.ShapeDtypeStruct((B, Gp), out_dtype),
                  jax.ShapeDtypeStruct((B, Gp), out_dtype))
    out_specs = [pl.BlockSpec((B, 3 * tile_g), lambda j: (0, j)),
                 pl.BlockSpec((B, tile_g), lambda j: (0, j)),
                 pl.BlockSpec((B, tile_g), lambda j: (0, j))]

    pi2d, px_rho, px_tau = pl.pallas_call(
        _heads_kernel,
        out_shape=out_shapes,
        grid=(n_tiles,),
        in_specs=in_specs,
        out_specs=out_specs,
        compiler_params=pltpu.CompilerParams(
            dimension_semantics=("parallel",),
            vmem_limit_bytes=vmem_limit),
    )(*head_args)

    # torch: reshape((B, 3*G) -> (B, G, 3)); softplus applied pre-reshape is
    # equivalent (elementwise).  Slice off gene padding only when present.
    px_pi = pi2d.reshape(B, Gp, 3)
    if Gp != G:
        px_pi = px_pi[:, :G, :]
        px_rho = px_rho[:, :G]
        px_tau = px_tau[:, :G]
    return px_pi, px_rho, px_tau


# ----------------------------------------------------------------------------
# Deterministic parameter init (mimics nn.Linear default init shapes/bounds).
# All parameters stay f32 (torch fidelity); bf16 casting happens in prep.
# ----------------------------------------------------------------------------
def _linear_init(key, fan_in, fan_out):
    kw, kb = jax.random.split(key)
    bound = 1.0 / math.sqrt(fan_in)
    w = jax.random.uniform(kw, (fan_in, fan_out), jnp.float32, -bound, bound)
    b = jax.random.uniform(kb, (1, fan_out), jnp.float32, -bound, bound)
    return w, b


def init_params(key, n_input, n_output, n_hidden, mode):
    keys = jax.random.split(key, 6)
    p = {}
    p["rho_w1"], p["rho_b1"] = _linear_init(keys[0], n_input, n_hidden)
    p["rho_g1"] = jnp.ones((1, n_hidden), jnp.float32)
    p["rho_be1"] = jnp.zeros((1, n_hidden), jnp.float32)
    if mode == "global":
        p["t_w"], p["t_b"] = _linear_init(keys[1], n_hidden, 1)
    elif mode == "decouple":
        p["pi_w1"], p["pi_b1"] = _linear_init(keys[2], n_input, n_hidden)
        p["pi_g1"] = jnp.ones((1, n_hidden), jnp.float32)
        p["pi_be1"] = jnp.zeros((1, n_hidden), jnp.float32)
        p["pxpi_w"], p["pxpi_b"] = _linear_init(keys[3], n_hidden, 3 * n_output)
        p["pxrho_w"], p["pxrho_b"] = _linear_init(keys[4], n_hidden, n_output)
        p["pxtau_w"], p["pxtau_b"] = _linear_init(keys[5], n_hidden, n_output)
    return p


# ----------------------------------------------------------------------------
# Pure-JAX f32 reference (torch-equivalent forward, no bf16 anywhere).
# ----------------------------------------------------------------------------
def _fc_ref(x, w, b, g, be):
    h = x @ w + b
    m = h.mean(axis=0, keepdims=True)
    v = ((h - m) ** 2).mean(axis=0, keepdims=True)
    return jnp.maximum((h - m) * (g * jax.lax.rsqrt(v + BN_EPS)) + be, 0.0)


def _ref_global(z, p, latent_dim=None):
    rho = _fc_ref(_mask_z(z, latent_dim), p["rho_w1"], p["rho_b1"],
                  p["rho_g1"], p["rho_be1"])
    return jax.nn.sigmoid(rho @ p["t_w"] + p["t_b"])


def _ref_decouple(z, p, n_output, latent_dim=None):
    rho = _fc_ref(_mask_z(z, latent_dim), p["rho_w1"], p["rho_b1"],
                  p["rho_g1"], p["rho_be1"])               # rho branch: z_in
    pi = _fc_ref(z, p["pi_w1"], p["pi_b1"],                # pi branch: raw z
                 p["pi_g1"], p["pi_be1"])
    px_rho = jax.nn.sigmoid(rho @ p["pxrho_w"] + p["pxrho_b"])
    px_tau = jax.nn.sigmoid(rho @ p["pxtau_w"] + p["pxtau_b"])
    px_pi = jax.nn.softplus(pi @ p["pxpi_w"] + p["pxpi_b"])
    return px_pi.reshape(z.shape[0], n_output, 3), px_rho, px_tau


# ----------------------------------------------------------------------------
if __name__ == "__main__":
    # n_hidden = 128 (module default, MXU/lane aligned); B = 8 (one f32
    # sublane tile); n_input = 8 (latent dim).
    B, n_input, n_hidden = 8, 8, 128

    key = jax.random.PRNGKey(0)
    kz, kpg, kpd, kpd2 = jax.random.split(key, 4)
    z = jax.random.normal(kz, (B, n_input), jnp.float32)

    # ---- mode == "global" (module default; full f32) ------------------------
    pg = init_params(kpg, n_input, 256, n_hidden, "global")
    gprep = prepare_global_params(pg)

    prob_t = decoder_velovi_global(z, gprep)
    jax.block_until_ready(prob_t)
    assert prob_t.shape == (B, 1)
    assert jnp.allclose(prob_t, _ref_global(z, pg), atol=1e-4, rtol=1e-4)

    prob_t_m = decoder_velovi_global(z, gprep, latent_dim=2)
    jax.block_until_ready(prob_t_m)
    assert jnp.allclose(prob_t_m, _ref_global(z, pg, latent_dim=2),
                        atol=1e-4, rtol=1e-4)

    # ---- mode == "decouple", n_output multiple of 128 ------------------------
    G1 = 256
    pd = init_params(kpd, n_input, G1, n_hidden, "decouple")
    dprep = prepare_decouple_params(pd, G1, tile_g=128)   # grid=(2,) tiled path

    px_pi, px_rho, px_tau = decoder_velovi_decouple(z, dprep)
    jax.block_until_ready((px_pi, px_rho, px_tau))
    assert px_pi.shape == (B, G1, 3)
    assert px_rho.shape == (B, G1) and px_tau.shape == (B, G1)
    r_pi, r_rho, r_tau = _ref_decouple(z, pd, G1)
    tol = dict(atol=2e-2, rtol=2e-2)   # bf16 weight/activation streaming
    assert jnp.allclose(px_pi, r_pi, **tol)
    assert jnp.allclose(px_rho, r_rho, **tol)
    assert jnp.allclose(px_tau, r_tau, **tol)

    # bf16 output path + latent-dim masking.
    px_pi_b, px_rho_b, px_tau_b = decoder_velovi_decouple(
        z, dprep, latent_dim=1, out_dtype=jnp.bfloat16)
    jax.block_until_ready((px_pi_b, px_rho_b, px_tau_b))
    r_pi_m, r_rho_m, r_tau_m = _ref_decouple(z, pd, G1, latent_dim=1)
    tol_b = dict(atol=5e-2, rtol=5e-2)
    assert jnp.allclose(px_pi_b.astype(jnp.float32), r_pi_m, **tol_b)
    assert jnp.allclose(px_rho_b.astype(jnp.float32), r_rho_m, **tol_b)
    assert jnp.allclose(px_tau_b.astype(jnp.float32), r_tau_m, **tol_b)

    # ---- mode == "decouple", n_output NOT a multiple of 128 (padding path) ---
    G2 = 200
    pd2 = init_params(kpd2, n_input, G2, n_hidden, "decouple")
    dprep2 = prepare_decouple_params(pd2, G2)              # auto tile, Gp=256
    px_pi2, px_rho2, px_tau2 = decoder_velovi_decouple(z, dprep2)
    jax.block_until_ready((px_pi2, px_rho2, px_tau2))
    assert px_pi2.shape == (B, G2, 3)
    assert px_rho2.shape == (B, G2) and px_tau2.shape == (B, G2)
    r_pi2, r_rho2, r_tau2 = _ref_decouple(z, pd2, G2)
    assert jnp.allclose(px_pi2, r_pi2, **tol)
    assert jnp.allclose(px_rho2, r_rho2, **tol)
    assert jnp.allclose(px_tau2, r_tau2, **tol)

    print("KERNEL_OK")
</pallas_src>

<mosaic_0001>
module attributes {stable_mosaic.version = 11 : i64} {
  func.func @_global_kernel(%arg0: memref<8x8xf32, #tpu.memory_space<vmem>>, %arg1: memref<8x128xf32, #tpu.memory_space<vmem>>, %arg2: memref<1x128xf32, #tpu.memory_space<vmem>>, %arg3: memref<1x128xf32, #tpu.memory_space<vmem>>, %arg4: memref<1x128xf32, #tpu.memory_space<vmem>>, %arg5: memref<1x128xf32, #tpu.memory_space<vmem>>, %arg6: memref<1x1xf32, #tpu.memory_space<vmem>>, %arg7: memref<8x1xf32, #tpu.memory_space<vmem>>) attributes {dimension_semantics = [], scalar_prefetch = 0 : i64, scratch_operands = 0 : i64, tpu.core_type = #tpu.core_type<tc>} {
    %c0 = arith.constant 0 : index
    %c0_0 = arith.constant 0 : index
    %0 = vector.load %arg0[%c0, %c0_0] : memref<8x8xf32, #tpu.memory_space<vmem>>, vector<8x8xf32>
    %c0_1 = arith.constant 0 : index
    %c0_2 = arith.constant 0 : index
    %1 = vector.load %arg1[%c0_1, %c0_2] : memref<8x128xf32, #tpu.memory_space<vmem>>, vector<8x128xf32>
    %c0_3 = arith.constant 0 : index
    %c0_4 = arith.constant 0 : index
    %2 = vector.load %arg2[%c0_3, %c0_4] : memref<1x128xf32, #tpu.memory_space<vmem>>, vector<1x128xf32>
    %c0_5 = arith.constant 0 : index
    %c0_6 = arith.constant 0 : index
    %3 = vector.load %arg3[%c0_5, %c0_6] : memref<1x128xf32, #tpu.memory_space<vmem>>, vector<1x128xf32>
    %c0_7 = arith.constant 0 : index
    %c0_8 = arith.constant 0 : index
    %4 = vector.load %arg4[%c0_7, %c0_8] : memref<1x128xf32, #tpu.memory_space<vmem>>, vector<1x128xf32>
    %cst = arith.constant dense<0.000000e+00> : vector<8x128xf32>
    %5 = tpu.matmul %0, %1, %cst {dimension_numbers = #tpu.dot_dimension_numbers<[1], [0], [0], [1], [0, 0, 1, 1], [], []>} : vector<8x8xf32>, vector<8x128xf32>, vector<8x128xf32> -> vector<8x128xf32>
    %6 = vector.broadcast %2 : vector<1x128xf32> to vector<8x128xf32>
    %7 = arith.addf %5, %6 : vector<8x128xf32>
    %cst_9 = arith.constant dense<0.000000e+00> : vector<128xf32>
    %8 = vector.multi_reduction <add>, %7, %cst_9 [0] : vector<8x128xf32> to vector<128xf32>
    %9 = vector.shape_cast %8 : vector<128xf32> to vector<1x128xf32>
    %cst_10 = arith.constant 8.000000e+00 : f32
    %10 = vector.broadcast %cst_10 : f32 to vector<1x128xf32>
    %11 = arith.divf %9, %10 : vector<1x128xf32>
    %12 = vector.broadcast %11 : vector<1x128xf32> to vector<8x128xf32>
    %13 = arith.subf %7, %12 : vector<8x128xf32>
    %14 = arith.mulf %13, %13 : vector<8x128xf32>
    %cst_11 = arith.constant dense<0.000000e+00> : vector<128xf32>
    %15 = vector.multi_reduction <add>, %14, %cst_11 [0] : vector<8x128xf32> to vector<128xf32>
    %16 = vector.shape_cast %15 : vector<128xf32> to vector<1x128xf32>
    %cst_12 = arith.constant 8.000000e+00 : f32
    %17 = vector.broadcast %cst_12 : f32 to vector<1x128xf32>
    %18 = arith.divf %16, %17 : vector<1x128xf32>
    %cst_13 = arith.constant 1.000000e-03 : f32
    %19 = vector.broadcast %cst_13 : f32 to vector<1x128xf32>
    %20 = arith.addf %18, %19 : vector<1x128xf32>
    %21 = math.rsqrt %20 : vector<1x128xf32>
    %22 = arith.mulf %3, %21 : vector<1x128xf32>
    %23 = vector.broadcast %11 : vector<1x128xf32> to vector<8x128xf32>
    %24 = arith.subf %7, %23 : vector<8x128xf32>
    %25 = vector.broadcast %22 : vector<1x128xf32> to vector<8x128xf32>
    %26 = arith.mulf %24, %25 : vector<8x128xf32>
    %27 = vector.broadcast %4 : vector<1x128xf32> to vector<8x128xf32>
    %28 = arith.addf %26, %27 : vector<8x128xf32>
    %cst_14 = arith.constant 0.000000e+00 : f32
    %29 = vector.broadcast %cst_14 : f32 to vector<8x128xf32>
    %30 = arith.maximumf %28, %29 : vector<8x128xf32>
    %c0_15 = arith.constant 0 : index
    %c0_16 = arith.constant 0 : index
    %31 = vector.load %arg5[%c0_15, %c0_16] : memref<1x128xf32, #tpu.memory_space<vmem>>, vector<1x128xf32>
    %32 = vector.broadcast %31 : vector<1x128xf32> to vector<8x128xf32>
    %33 = arith.mulf %30, %32 : vector<8x128xf32>
    %cst_17 = arith.constant dense<0.000000e+00> : vector<8xf32>
    %34 = vector.multi_reduction <add>, %33, %cst_17 [1] : vector<8x128xf32> to vector<8xf32>
    %35 = vector.shape_cast %34 : vector<8xf32> to vector<8x1xf32>
    %c0_18 = arith.constant 0 : index
    %c0_19 = arith.constant 0 : index
    %36 = vector.load %arg6[%c0_18, %c0_19] : memref<1x1xf32, #tpu.memory_space<vmem>>, vector<1x1xf32>
    %37 = vector.broadcast %36 : vector<1x1xf32> to vector<8x1xf32>
    %38 = arith.addf %35, %37 : vector<8x1xf32>
    %cst_20 = arith.constant 5.000000e-01 : f32
    %39 = vector.broadcast %cst_20 : f32 to vector<8x1xf32>
    %40 = arith.mulf %39, %38 : vector<8x1xf32>
    %41 = math.tanh %40 : vector<8x1xf32>
    %cst_21 = arith.constant 1.000000e+00 : f32
    %42 = vector.broadcast %cst_21 : f32 to vector<8x1xf32>
    %43 = arith.addf %41, %42 : vector<8x1xf32>
    %cst_22 = arith.constant 5.000000e-01 : f32
    %44 = vector.broadcast %cst_22 : f32 to vector<8x1xf32>
    %45 = arith.mulf %44, %43 : vector<8x1xf32>
    %c0_23 = arith.constant 0 : index
    %c0_24 = arith.constant 0 : index
    %46 = vector.load %arg7[%c0_23, %c0_24] : memref<8x1xf32, #tpu.memory_space<vmem>>, vector<8x1xf32>
    tpu.vector_store %arg7[%c0_23, %c0_24], %45 {strides = array<i32>} : memref<8x1xf32, #tpu.memory_space<vmem>>, vector<8x1xf32>,
    return
  }
}

</mosaic_0001>

<bundles_post_ra>
// kernel: tpu_custom_call.1
= control target key start
LH: loop header
LB: loop body
LE: loop exit
PB: predicated region body
PF: predicated region fallthrough
CT: control target
= control target key end

     0   :  { %s356_s0 = inlined_call_operand.hbm [shape: f32[8,8], index: 0, kind: input, shape index: {}]   ;;  %s357_s1 = inlined_call_operand.hbm [shape: f32[8,128], index: 1, kind: input, shape index: {}]   ;;  %s358_s2 = inlined_call_operand.vmem [shape: f32[1,128], index: 2, kind: input, shape index: {}]   ;;  %s359_s3 = inlined_call_operand.vmem [shape: f32[1,128], index: 3, kind: input, shape index: {}]   ;;  %s360_s4 = inlined_call_operand.vmem [shape: f32[1,128], index: 4, kind: input, shape index: {}]   ;;  %s361_s5 = inlined_call_operand.vmem [shape: f32[1,128], index: 5, kind: input, shape index: {}]   ;;  %s362_s6 = inlined_call_operand.<no memory space> [shape: f32[1,1], index: 6, kind: input, shape index: {}]   ;;  %s363_s7 = inlined_call_operand.vmem [shape: f32[8,1], index: 7, kind: output, shape index: {}]  }
   0x1   :  { %v12_v0 = vstv %s362_s6 }
   0x2   :  { %13 = vst [vmem:[#allocation2] sm:$0x1] %v12_v0 }
   0x3   :  { %14 = vsyncpa [#allocation4], 0 }
   0x4   :  { %15 = vsyncpa [#allocation6], 0  ;;  %s270_s26 = smov [#allocation3]   ;;  %s271_s28 = smov [#allocation5]  }
   0x5   :  { %s22_s27 = sshll.u32 %s270_s26, 4  ;;  %s32_s29 = sshll.u32 %s271_s28, 4  ;;  %s23_s27 = int_to_ptr.vmem [resolvable:$true] %s22_s27  ;;  %s33_s29 = int_to_ptr.vmem [resolvable:$true] %s32_s29 }
   0x6   :  { %s222_s9 = scalar_lea.hbm %s356_s0, 128 }
   0x7   :  { %p223_p0 = scmp.ne.s32.totalorder %s356_s0, %s222_s9  ;;  %p226_p1 = scmp.lt.u32.totalorder %s222_s9, %s356_s0 }
   0x9   :  { %p228_p2 = pnand %p226_p1, %p223_p0 }
   0xb   :  { %231 = shalt.err (!%p228_p2)
}
   0xc   :  { %s232_s6 = scalar_lea.vmem %s23_s27, 128  ;;  %p237_p4 = scmp.lt.s32.totalorder %s23_s27, %s23_s27 }
   0xd   :  { %p233_p3 = scmp.ne.s32.totalorder %s23_s27, %s232_s6  ;;  %p238_p5 = scmp.lt.s32.totalorder %s232_s6, %s232_s6 }
   0xf   :  { %p239_p6 = por %p238_p5, %p237_p4 }
  0x11   :  { %p240_p7 = pnand %p239_p6, %p233_p3 }
  0x13   :  { %243 = shalt.err (!%p240_p7)
}
  0x14   :  { %25 = dma.hbm_to_vmem [thread:$0]  %s356_s0, 128, %s23_s27, [#allocation4]  }
  0x15   :  { %s244_s18 = scalar_lea.hbm %s357_s1, 128 }
  0x16   :  { %p245_p8 = scmp.ne.s32.totalorder %s357_s1, %s244_s18  ;;  %p248_p9 = scmp.lt.u32.totalorder %s244_s18, %s357_s1 }
  0x18   :  { %p250_p10 = pnand %p248_p9, %p245_p8 }
  0x1a   :  { %253 = shalt.err (!%p250_p10)
}
  0x1b   :  { %s254_s23 = scalar_lea.vmem %s33_s29, 128  ;;  %p259_p12 = scmp.lt.s32.totalorder %s33_s29, %s33_s29 }
  0x1c   :  { %p255_p11 = scmp.ne.s32.totalorder %s33_s29, %s254_s23  ;;  %p260_p13 = scmp.lt.s32.totalorder %s254_s23, %s254_s23 }
  0x1e   :  { %p261_p0 = por %p260_p13, %p259_p12 }
  0x20   :  { %p262_p1 = pnand %p261_p0, %p255_p11 }
  0x22   :  { %265 = shalt.err (!%p262_p1)
}
  0x23   :  { %35 = dma.hbm_to_vmem [thread:$0]  %s357_s1, 128, %s33_s29, [#allocation6]  }
  0x24   :  { %266 = dma.done.wait [#allocation4], 128  }
  0x25   :  { %267 = vsyncadd [#allocation4], 4294967168 }
  0x26   :  { %268 = dma.done.wait [#allocation6], 128  }
  0x27   :  { %269 = vsyncadd [#allocation6], 4294967168  ;;  %v272_v1 = vmov 0.0   ;;  %vm273_vm0 = vmmov 0   ;;  %vm63_vm1 = vcmask 64512   ;;  %v53_v2 = vld [vmem:[#allocation5] sm:$0xff]  ;;  %v158_v25 = vlaneseq }
  0x28   :  { %209 = vmatprep.subr.mxu0 %v272_v1  ;;  %211 = vmatprep.mubr.msk.f32.mxu0 %vm273_vm0, %v272_v1  ;;  %v52_v3 = vld [vmem:[#allocation3] sm:$0xff]  ;;  %v202_v4 = vld [vmem:[%s358_s2] ss:$0 sm:$0xff]  ;;  %vm194_vm2 = vcmask 7168  }
  0x29   :  { %210 = vmatpush3.msra.mxu0 %v53_v2  ;;  %v159_v26 = vshrl.u32 %v158_v25, 7  ;;  %v55_v27 = vld [vmem:[%s359_s3] sm:$0x1] }
  0x2a   :  { %212 = vmatmul.mubr.msk.f32.vlgmr.msra.gmra.mrb[0].mxu0 %vm63_vm1, %v52_v3  ;;  %v204_v32 = vld [vmem:[%s360_s4] ss:$0 sm:$0xff] }
  0x2b   :  { %v160_v28 = vsub.s32 0, %v159_v26  ;;  %v205_v35 = vld [vmem:[%s361_s5] ss:$0 sm:$0xff] }
  0x2c   :  { %v206_v38 = vld [vmem:[#allocation2] ss:$0 sm:$0xff] }
  0xfd   :  { %v133_v5 = vpop.f32.mrb[0].mxu0 }
  0xfe   :  { %v134_v6 = vadd.f32 %v202_v4, %v133_v5  ;;  %v213_v7 = vpop.f32.mrb[1].mxu0 }
 0x100   :  { %v137_v8 = vrot.slane %v134_v6, 4 }
 0x102   :  { %v138_v9 = vadd.f32 %v137_v8, %v134_v6 }
 0x104   :  { %v139_v10 = vrot.slane %v138_v9, 2 }
 0x106   :  { %v140_v11 = vadd.f32 %v139_v10, %v138_v9 }
 0x108   :  { %v141_v12 = vrot.slane %v140_v11, 1 }
 0x10a   :  { %v142_v13 = vadd.f32 %v141_v12, %v140_v11 }
 0x10c   :  { %v144_v14 = vmul.f32 0.125, %v142_v13 }
 0x10e   :  { %v145_v15 = vsub.f32 %v134_v6, %v144_v14 }
 0x110   :  { %v146_v16 = vmul.f32 %v145_v15, %v145_v15 }
 0x112   :  { %v147_v17 = vrot.slane %v146_v16, 4 }
 0x114   :  { %v148_v18 = vadd.f32 %v147_v17, %v146_v16 }
 0x116   :  { %v149_v19 = vrot.slane %v148_v18, 2 }
 0x118   :  { %v150_v20 = vadd.f32 %v149_v19, %v148_v18 }
 0x11a   :  { %v151_v21 = vrot.slane %v150_v20, 1 }
 0x11c   :  { %v152_v22 = vadd.f32 %v151_v21, %v150_v20 }
 0x11e   :  { %v153_v23 = vmul.f32 0.125, %v152_v22 }
 0x120   :  { %v154_v24 = vadd.f32 0.001, %v153_v23 }
 0x122   :  { %218 = vrsqrt.f32 %v154_v24 }
 0x12c   :  { %v219_v29 = vpop.eup %218 }
 0x12d   :  { %v156_v30 = vmul.f32 %v219_v29, %v55_v27 }
 0x12f   :  { %v161_v31 = vrot.slane %v156_v30, %v160_v28 }
 0x131   :  { %v163_v33 = vmul.f32 %v161_v31, %v145_v15 }
 0x133   :  { %v170_v34 = vadd.f32 %v204_v32, %v163_v33 }
 0x135   :  { %v171_v36 = vmax.f32 %v170_v34, 0.0 }
 0x137   :  { %v179_v37 = vmul.f32 %v205_v35, %v171_v36 }
 0x139   :  { %180 = vadd.xlane.f32.xlu0 %v179_v37 }
 0x1c6   :  { %v181_v39 = vpop.xlane.xlu0 %180 }
 0x1c7   :  { %v189_v40 = vadd.f32 %v206_v38, %v181_v39 }
 0x1c9   :  { %v190_v41 = vmul.f32 0.5, %v189_v40 }
 0x1cb   :  { %220 = vtanh.f32 %v190_v41 }
 0x1d5   :  { %v221_v42 = vpop.eup %220 }
 0x1d6   :  { %v192_v43 = vadd.f32 1.0, %v221_v42 }
 0x1d8   :  { %v193_v44 = vmul.f32 0.5, %v192_v43 }
 0x1da   :  { %195 = vst.msk [vmem:[%s363_s7] sm:$0xff] %vm194_vm2, %v193_v44 }
 0x1db   :  { %200 = vsyncpa [#allocation4], 1 }
 0x1dc   :  { %201 = vsyncpa [#allocation6], 1 }

</bundles_post_ra>
